<compile_context>
chip_gen: v5e
topology: v5e:2x2
jax: 0.10.0
libtpu: 0.0.40
codegen_flags: <defaults>
</compile_context>

<pallas_src>
import functools

import jax
import jax.numpy as jnp
from jax.experimental import pallas as pl
from jax.experimental.pallas import tpu as pltpu


# Masks padded category columns out of max/sum (finite -> no inf/NaN arithmetic).
_NEG_BIG = -1e30


def _round_up(n: int, m: int) -> int:
    return ((n + m - 1) // m) * m


def _buf_bytes(rows, cols, itemsize):
    # VMEM footprint of one buffer, rounded up to (8, 128) tiling.
    return _round_up(max(rows, 1), 8) * _round_up(cols, 128) * itemsize


# ---------------------------------------------------------------------------
# One-time capability / hardware probes (module level, NOT per call)
# ---------------------------------------------------------------------------

def _probe_pipeline_mode() -> bool:
    """Does this JAX accept pipeline_mode=pl.Buffered(k) on a grid BlockSpec?"""
    try:
        pl.BlockSpec((8, 128), lambda i: (0, 0), pipeline_mode=pl.Buffered(1))
        return True
    except (TypeError, AttributeError):
        return False


_HAS_PIPELINE_MODE = _probe_pipeline_mode()


def _tpu_generation_info():
    """Returns (per-core VMEM capacity in bytes, has bf16 EUP)."""
    kind = ""
    try:
        kind = jax.devices()[0].device_kind.lower()
    except Exception:
        pass
    vmem_cap = None
    try:
        vmem_cap = int(pltpu.get_tpu_info().vmem_capacity_bytes)
    except Exception:
        vmem_cap = None
    if not vmem_cap or vmem_cap <= 0:
        # v7x: 64 MiB per TensorCore; v5e/v6e: 128 MiB.
        vmem_cap = (64 << 20) if "v7" in kind else (128 << 20)
    # v5e and older have no bf16 EUP; v6e/v7x do.
    old_gen = any(t in kind for t in ("v2", "v3", "v4", "v5"))
    return vmem_cap, (not old_gen)


_VMEM_CAP, _HAS_BF16_EUP = _tpu_generation_info()


# ---------------------------------------------------------------------------
# Kernels
# ---------------------------------------------------------------------------

def _resident_kernel(x_ref, wt_ref, b_ref, o_ref, *, use_bf16_exp):
    # x: (tb, H)   wt: (H, O_pad)   b: (1, O_pad)   o: (tb, O_pad)
    logits = jnp.dot(x_ref[...], wt_ref[...], preferred_element_type=jnp.float32)
    logits = logits + b_ref[...].astype(jnp.float32)

    # LogSoftmax over categories. Padded columns carry a -1e30 bias, so they
    # never win the max and contribute exp(...) == 0 to the sum.
    m = jnp.max(logits, axis=-1, keepdims=True)
    shifted = logits - m
    if use_bf16_exp:
        # Small-H heads are EUP-bound on v6e/v7x: bf16 exp ~doubles EUP
        # throughput; argument <= 0 and f32 accumulation keep the sum accurate
        # enough for a bf16 output.
        s = jnp.sum(jnp.exp(shifted.astype(jnp.bfloat16)).astype(jnp.float32),
                    axis=-1, keepdims=True)
    else:
        s = jnp.sum(jnp.exp(shifted), axis=-1, keepdims=True)
    # out = logits - (m + log s) = shifted - log s
    o_ref[...] = (shifted - jnp.log(s)).astype(o_ref.dtype)


def _otiled_kernel(x_ref, wt_ref, b_ref, o_ref, m_sc, l_sc, acc_sc, *, block_o):
    # Grid: (batch tiles, category tiles). Online (flash-style) max/sum across
    # the category axis; raw f32 logits parked in VMEM scratch; normalized
    # output written once per batch tile on the last category step.
    j = pl.program_id(1)
    nj = pl.num_programs(1)

    @pl.when(j == 0)
    def _():
        m_sc[...] = jnp.full_like(m_sc, -jnp.inf)
        l_sc[...] = jnp.zeros_like(l_sc)

    logits = jnp.dot(x_ref[...], wt_ref[...], preferred_element_type=jnp.float32)
    logits = logits + b_ref[...].astype(jnp.float32)

    m_prev = m_sc[...]
    m_new = jnp.maximum(m_prev, jnp.max(logits, axis=-1, keepdims=True))
    l_sc[...] = (l_sc[...] * jnp.exp(m_prev - m_new)
                 + jnp.sum(jnp.exp(logits - m_new), axis=-1, keepdims=True))
    m_sc[...] = m_new

    off = pl.multiple_of(j * block_o, block_o)
    acc_sc[:, pl.ds(off, block_o)] = logits

    @pl.when(j == nj - 1)
    def _():
        row_const = m_sc[...] + jnp.log(l_sc[...])
        o_ref[...] = (acc_sc[...] - row_const).astype(o_ref.dtype)


# ---------------------------------------------------------------------------
# Static planning (block sizes, path selection, VMEM budget)
# ---------------------------------------------------------------------------

def _choose_block_b(B, max_rows):
    max_rows = max(8, (max_rows // 8) * 8)
    if B < 16:
        return min(_round_up(max(B, 1), 8), max_rows)
    # Keep >= 2 grid steps so both v7x TensorCores get work and the x / out
    # DMAs pipeline against compute.
    target = min(-(-B // 2), max_rows, 1024)
    if target >= 512:
        align = 256      # MXU-aligned M tile on v6e/v7x
    elif target >= 128:
        align = 128
    else:
        align = 8
    return max((target // align) * align, 8)


@functools.lru_cache(maxsize=None)
def _plan(B, H, O_pad, in_itemsize, w_itemsize, out_itemsize, force_o_tiling):
    vmem_cap = _VMEM_CAP
    usable = int(vmem_cap * 0.85) - (4 << 20)   # headroom for internal scratch
    w_bufs = 1 if _HAS_PIPELINE_MODE else 2

    # ---------------- resident-weight path ----------------
    weight_bytes = w_bufs * (_buf_bytes(H, O_pad, w_itemsize) + _buf_bytes(1, O_pad, 4))
    # Per batch-row cost: double-buffered x and out tiles PLUS the in-kernel f32
    # logits / exp temporaries (previously uncounted -> spills / OOM on v7x).
    per_row = (2 * _round_up(H, 128) * in_itemsize
               + 2 * O_pad * out_itemsize
               + 3 * O_pad * 4)
    avail = usable - weight_bytes
    if (not force_o_tiling) and avail >= 8 * per_row:
        block_b = _choose_block_b(B, int(avail // per_row))
        steps = _round_up(B, block_b) // block_b
        # If VMEM pressure forced a small tile, deepen only the x pipeline.
        x_bufs = 3 if (_HAS_PIPELINE_MODE and block_b <= 64 and steps >= 3) else 2
        budget = (weight_bytes
                  + x_bufs * _buf_bytes(block_b, H, in_itemsize)
                  + 2 * _buf_bytes(block_b, O_pad, out_itemsize)
                  + 3 * _buf_bytes(block_b, O_pad, 4))
        vmem_limit = int(min(max(budget + (8 << 20), 32 << 20), vmem_cap))
        return dict(path="resident", block_b=block_b, block_o=None,
                    x_bufs=x_bufs, vmem_limit=vmem_limit)

    # ---------------- O-tiled online-softmax path (vocab-scale heads) --------
    block_o = 128
    for cand in (1024, 512, 256, 128):
        if O_pad % cand == 0 and 2 * _buf_bytes(H, cand, w_itemsize) <= usable // 3:
            block_o = cand
            break
    fixed = 2 * _buf_bytes(H, block_o, w_itemsize) + 2 * _buf_bytes(1, block_o, 4)
    per_row = (2 * _round_up(H, 128) * in_itemsize   # x (resident over j)
               + 2 * O_pad * out_itemsize            # out (written once per batch tile)
               + O_pad * 4                           # f32 logits accumulator scratch
               + 3 * block_o * 4                     # per-tile f32 temps
               + 2 * 128 * 4)                        # running max / sum scratch
    max_rows = max((usable - fixed) // per_row, 8)
    block_b = _choose_block_b(B, int(max_rows))
    budget = (fixed
              + 2 * _buf_bytes(block_b, H, in_itemsize)
              + 2 * _buf_bytes(block_b, O_pad, out_itemsize)
              + _buf_bytes(block_b, O_pad, 4)
              + 3 * _buf_bytes(block_b, block_o, 4)
              + 2 * _buf_bytes(block_b, 1, 4))
    vmem_limit = int(min(max(budget + (8 << 20), 32 << 20), vmem_cap))
    return dict(path="otiled", block_b=block_b, block_o=block_o,
                x_bufs=2, vmem_limit=vmem_limit)


# ---------------------------------------------------------------------------
# Jitted implementations
# ---------------------------------------------------------------------------

def _maybe_pad_rows(x, B_pad):
    B = x.shape[0]
    return x if B_pad == B else jnp.pad(x, ((0, B_pad - B), (0, 0)))


def _slice_out(out, B, O):
    # Skip the post-kernel copy entirely when already aligned; otherwise slice
    # only the padded dimension(s).
    B_pad, O_pad = out.shape
    if B_pad == B and O_pad == O:
        return out
    if O_pad == O:
        return out[:B]
    if B_pad == B:
        return out[:, :O]
    return out[:B, :O]


@functools.partial(
    jax.jit,
    static_argnames=("O", "block_b", "x_bufs", "use_bf16_exp", "vmem_limit"))
def _fused_resident(x, wt, bias2d, *, O, block_b, x_bufs, use_bf16_exp, vmem_limit):
    B, H = x.shape
    O_pad = wt.shape[1]
    B_pad = _round_up(B, block_b)
    out_dtype = x.dtype
    xp = _maybe_pad_rows(x, B_pad)

    grid = (B_pad // block_b,)

    if _HAS_PIPELINE_MODE:
        x_spec = pl.BlockSpec((block_b, H), lambda i: (i, 0),
                              pipeline_mode=pl.Buffered(x_bufs))
        # Weight / bias blocks are identical on every grid step: one buffer is
        # enough; the freed VMEM goes into a larger batch tile.
        w_spec = pl.BlockSpec((H, O_pad), lambda i: (0, 0),
                              pipeline_mode=pl.Buffered(1))
        b_spec = pl.BlockSpec((1, O_pad), lambda i: (0, 0),
                              pipeline_mode=pl.Buffered(1))
    else:
        x_spec = pl.BlockSpec((block_b, H), lambda i: (i, 0))
        w_spec = pl.BlockSpec((H, O_pad), lambda i: (0, 0))
        b_spec = pl.BlockSpec((1, O_pad), lambda i: (0, 0))
    out_spec = pl.BlockSpec((block_b, O_pad), lambda i: (i, 0))

    cost = pl.CostEstimate(
        flops=2 * B_pad * H * O_pad,
        transcendentals=B_pad * O_pad,
        bytes_accessed=(B_pad * H * x.dtype.itemsize
                        + H * O_pad * wt.dtype.itemsize
                        + O_pad * bias2d.dtype.itemsize
                        + B_pad * O_pad * out_dtype.itemsize),
    )

    out = pl.pallas_call(
        functools.partial(_resident_kernel, use_bf16_exp=use_bf16_exp),
        out_shape=jax.ShapeDtypeStruct((B_pad, O_pad), out_dtype),
        grid_spec=pltpu.PrefetchScalarGridSpec(
            num_scalar_prefetch=0,
            grid=grid,
            in_specs=[x_spec, w_spec, b_spec],
            out_specs=out_spec,
        ),
        compiler_params=pltpu.CompilerParams(
            dimension_semantics=("parallel",),
            vmem_limit_bytes=vmem_limit,
        ),
        cost_estimate=cost,
    )(xp, wt, bias2d)
    return _slice_out(out, B, O)


@functools.partial(
    jax.jit,
    static_argnames=("O", "block_b", "block_o", "vmem_limit"))
def _fused_otiled(x, wt, bias2d, *, O, block_b, block_o, vmem_limit):
    B, H = x.shape
    O_pad = wt.shape[1]
    assert O_pad % block_o == 0
    B_pad = _round_up(B, block_b)
    out_dtype = x.dtype
    xp = _maybe_pad_rows(x, B_pad)

    grid = (B_pad // block_b, O_pad // block_o)

    x_spec = pl.BlockSpec((block_b, H), lambda i, j: (i, 0))
    w_spec = pl.BlockSpec((H, block_o), lambda i, j: (0, j))
    b_spec = pl.BlockSpec((1, block_o), lambda i, j: (0, j))
    out_spec = pl.BlockSpec((block_b, O_pad), lambda i, j: (i, 0))

    cost = pl.CostEstimate(
        flops=2 * B_pad * H * O_pad,
        transcendentals=B_pad * O_pad,
        bytes_accessed=(B_pad * H * x.dtype.itemsize
                        + (B_pad // block_b) * H * O_pad * wt.dtype.itemsize
                        + O_pad * bias2d.dtype.itemsize
                        + B_pad * O_pad * out_dtype.itemsize),
    )

    out = pl.pallas_call(
        functools.partial(_otiled_kernel, block_o=block_o),
        out_shape=jax.ShapeDtypeStruct((B_pad, O_pad), out_dtype),
        grid_spec=pltpu.PrefetchScalarGridSpec(
            num_scalar_prefetch=0,
            grid=grid,
            in_specs=[x_spec, w_spec, b_spec],
            out_specs=out_spec,
            scratch_shapes=[
                pltpu.VMEM((block_b, 1), jnp.float32),      # running max
                pltpu.VMEM((block_b, 1), jnp.float32),      # running sum
                pltpu.VMEM((block_b, O_pad), jnp.float32),  # raw f32 logits
            ],
        ),
        compiler_params=pltpu.CompilerParams(
            dimension_semantics=("parallel", "arbitrary"),
            vmem_limit_bytes=vmem_limit,
        ),
        cost_estimate=cost,
    )(xp, wt, bias2d)
    return _slice_out(out, B, O)


# ---------------------------------------------------------------------------
# Public wrappers
# ---------------------------------------------------------------------------

def prepare_log_softmax_params(weight, bias):
    """One-time relayout of nn.Linear params (call at parameter-load time).

    weight: (O, H) in PyTorch nn.Linear layout; bias: (O,).
    Returns (wt, bias2d, O): wt is (H, O_pad), O_pad = round_up(O, 128);
    padded bias columns carry -1e30 so they never affect max/sum.
    """
    O, H = weight.shape
    O_pad = _round_up(O, 128)
    wt = jnp.transpose(weight)
    bias2d = jnp.reshape(bias, (1, O))
    if O_pad != O:
        wt = jnp.pad(wt, ((0, 0), (0, O_pad - O)))
        bias2d = jnp.pad(bias2d, ((0, 0), (0, O_pad - O)), constant_values=_NEG_BIG)
    return wt, bias2d, O


def log_softmax_output_prepared(x, wt, bias2d, O, *, force_o_tiling=False):
    """Fused Linear + LogSoftmax(dim=1) using pre-relayouted parameters."""
    B, H = x.shape
    O_pad = wt.shape[1]
    plan = _plan(B, H, O_pad,
                 int(x.dtype.itemsize), int(wt.dtype.itemsize),
                 int(x.dtype.itemsize), bool(force_o_tiling))
    if plan["path"] == "resident":
        use_bf16_exp = bool(_HAS_BF16_EUP and H <= 256 and x.dtype == jnp.bfloat16)
        return _fused_resident(
            x, wt, bias2d, O=O, block_b=plan["block_b"], x_bufs=plan["x_bufs"],
            use_bf16_exp=use_bf16_exp, vmem_limit=plan["vmem_limit"])
    return _fused_otiled(
        x, wt, bias2d, O=O, block_b=plan["block_b"], block_o=plan["block_o"],
        vmem_limit=plan["vmem_limit"])


def log_softmax_output(x, weight, bias, *, force_o_tiling=False):
    """Drop-in forward: x (B, H), weight (O, H), bias (O,) -> (B, O).

    For repeated calls prefer prepare_log_softmax_params(...) once +
    log_softmax_output_prepared(...) so the weight transpose/pad is not
    re-done (an extra HBM pass over the weight) on every forward.
    """
    wt, bias2d, O = prepare_log_softmax_params(weight, bias)
    return log_softmax_output_prepared(x, wt, bias2d, O, force_o_tiling=force_o_tiling)


def _reference(x, weight, bias):
    logits = (x.astype(jnp.float32) @ weight.astype(jnp.float32).T
              + bias.astype(jnp.float32))
    return jax.nn.log_softmax(logits, axis=1)


if __name__ == "__main__":
    # ---- Case 1: tiny shapes consistent with the module; resident-weight path.
    B1, H1, O1 = 8, 32, 16
    key = jax.random.PRNGKey(0)
    kx, kw, kb = jax.random.split(key, 3)
    bound = 1.0 / (H1 ** 0.5)
    w1 = jax.random.uniform(kw, (O1, H1), minval=-bound, maxval=bound, dtype=jnp.float32)
    b1 = jax.random.uniform(kb, (O1,), minval=-bound, maxval=bound, dtype=jnp.float32)
    x1 = jax.random.normal(kx, (B1, H1), dtype=jnp.float32)

    wt1, bias1, O1p = prepare_log_softmax_params(w1, b1)   # one-time relayout
    out1 = log_softmax_output_prepared(x1, wt1, bias1, O1p)
    jax.block_until_ready(out1)
    ref1 = _reference(x1, w1, b1)
    assert out1.shape == (B1, O1)
    assert jnp.allclose(out1, ref1, atol=1e-5, rtol=1e-5), "mismatch (case 1)"

    # ---- Case 2: ragged batch -> row+col padding, multi-step grid, reusing the
    # already-prepared parameters (no per-call transpose/pad).
    x2 = jax.random.normal(jax.random.PRNGKey(1), (20, H1), dtype=jnp.float32)
    out2 = log_softmax_output_prepared(x2, wt1, bias1, O1p)
    jax.block_until_ready(out2)
    ref2 = _reference(x2, w1, b1)
    assert out2.shape == (20, O1)
    assert jnp.allclose(out2, ref2, atol=1e-5, rtol=1e-5), "mismatch (case 2)"

    # ---- Case 3: force the O-tiled online-softmax path (vocab-style head) at
    # small shapes: 3 category tiles exercise the running max/sum accumulator.
    B3, H3, O3 = 24, 64, 384
    k4, k5, k6 = jax.random.split(jax.random.PRNGKey(2), 3)
    bound3 = 1.0 / (H3 ** 0.5)
    w3 = jax.random.uniform(k5, (O3, H3), minval=-bound3, maxval=bound3, dtype=jnp.float32)
    b3 = jax.random.uniform(k6, (O3,), minval=-bound3, maxval=bound3, dtype=jnp.float32)
    x3 = jax.random.normal(k4, (B3, H3), dtype=jnp.float32)
    out3 = log_softmax_output(x3, w3, b3, force_o_tiling=True)
    jax.block_until_ready(out3)
    ref3 = _reference(x3, w3, b3)
    assert out3.shape == (B3, O3)
    assert jnp.allclose(out3, ref3, atol=1e-4, rtol=1e-4), "mismatch (case 3)"

    # ---- Case 4: bf16 inputs (exercises the bf16-EUP exp on v6e/v7x; f32 on v5e).
    B4, H4, O4 = 16, 64, 48
    k7, k8, k9 = jax.random.split(jax.random.PRNGKey(3), 3)
    bound4 = 1.0 / (H4 ** 0.5)
    w4 = jax.random.uniform(k8, (O4, H4), minval=-bound4, maxval=bound4,
                            dtype=jnp.float32).astype(jnp.bfloat16)
    b4 = jax.random.uniform(k9, (O4,), minval=-bound4, maxval=bound4,
                            dtype=jnp.float32).astype(jnp.bfloat16)
    x4 = jax.random.normal(k7, (B4, H4), dtype=jnp.float32).astype(jnp.bfloat16)
    out4 = log_softmax_output(x4, w4, b4)
    jax.block_until_ready(out4)
    ref4 = _reference(x4, w4, b4)
    assert out4.shape == (B4, O4)
    assert jnp.allclose(out4.astype(jnp.float32), ref4, atol=3e-2, rtol=3e-2), \
        "mismatch (case 4)"

    print("KERNEL_OK")
</pallas_src>

<mosaic_0001>
module attributes {stable_mosaic.version = 11 : i64} {
  func.func @_resident_kernel(%arg0: i32, %arg1: memref<8x32xf32, #tpu.memory_space<vmem>>, %arg2: memref<32x128xf32, #tpu.memory_space<vmem>>, %arg3: memref<1x128xf32, #tpu.memory_space<vmem>>, %arg4: memref<8x128xf32, #tpu.memory_space<vmem>>) attributes {dimension_semantics = [#tpu.dimension_semantics<parallel>], iteration_bounds = array<i64: 1>, scalar_prefetch = 0 : i64, scratch_operands = 0 : i64, tpu.core_type = #tpu.core_type<tc>, window_params = [{pipeline_mode = #tpu.pipeline_mode<double_buffered>, transform_indices = @transform_0, window_bounds = array<i64: 8, 32>}, {pipeline_mode = #tpu.pipeline_mode<synchronous>, transform_indices = @transform_1, window_bounds = array<i64: 32, 128>}, {pipeline_mode = #tpu.pipeline_mode<synchronous>, transform_indices = @transform_2, window_bounds = array<i64: 1, 128>}, {transform_indices = @transform_3, window_bounds = array<i64: 8, 128>}]} {
    %c0 = arith.constant 0 : index
    %c0_0 = arith.constant 0 : index
    %0 = vector.load %arg1[%c0, %c0_0] : memref<8x32xf32, #tpu.memory_space<vmem>>, vector<8x32xf32>
    %c0_1 = arith.constant 0 : index
    %c0_2 = arith.constant 0 : index
    %1 = vector.load %arg2[%c0_1, %c0_2] : memref<32x128xf32, #tpu.memory_space<vmem>>, vector<32x128xf32>
    %cst = arith.constant dense<0.000000e+00> : vector<8x128xf32>
    %2 = tpu.matmul %0, %1, %cst {dimension_numbers = #tpu.dot_dimension_numbers<[1], [0], [0], [1], [0, 0, 1, 1], [], []>} : vector<8x32xf32>, vector<32x128xf32>, vector<8x128xf32> -> vector<8x128xf32>
    %c0_3 = arith.constant 0 : index
    %c0_4 = arith.constant 0 : index
    %3 = vector.load %arg3[%c0_3, %c0_4] : memref<1x128xf32, #tpu.memory_space<vmem>>, vector<1x128xf32>
    %4 = vector.broadcast %3 : vector<1x128xf32> to vector<8x128xf32>
    %5 = arith.addf %2, %4 : vector<8x128xf32>
    %cst_5 = arith.constant dense<0xFF800000> : vector<8xf32>
    %6 = vector.multi_reduction <maximumf>, %5, %cst_5 [1] : vector<8x128xf32> to vector<8xf32>
    %7 = vector.shape_cast %6 : vector<8xf32> to vector<8x1xf32>
    %8 = vector.broadcast %7 : vector<8x1xf32> to vector<8x128xf32>
    %9 = arith.subf %5, %8 : vector<8x128xf32>
    %10 = math.exp %9 : vector<8x128xf32>
    %cst_6 = arith.constant dense<0.000000e+00> : vector<8xf32>
    %11 = vector.multi_reduction <add>, %10, %cst_6 [1] : vector<8x128xf32> to vector<8xf32>
    %12 = vector.shape_cast %11 : vector<8xf32> to vector<8x1xf32>
    %13 = math.log %12 : vector<8x1xf32>
    %14 = vector.broadcast %13 : vector<8x1xf32> to vector<8x128xf32>
    %15 = arith.subf %9, %14 : vector<8x128xf32>
    %c0_7 = arith.constant 0 : index
    %c0_8 = arith.constant 0 : index
    %16 = vector.load %arg4[%c0_7, %c0_8] : memref<8x128xf32, #tpu.memory_space<vmem>>, vector<8x128xf32>
    tpu.vector_store %arg4[%c0_7, %c0_8], %15 {strides = array<i32>} : memref<8x128xf32, #tpu.memory_space<vmem>>, vector<8x128xf32>,
    return
  }
  func.func @transform_0(%arg0: i32) -> (i32, i32) {
    %c0_i32 = arith.constant 0 : i32
    %c0_i32_0 = arith.constant 0 : i32
    return %arg0, %c0_i32 : i32, i32
  }
  func.func @transform_1(%arg0: i32) -> (i32, i32) {
    %c0_i32 = arith.constant 0 : i32
    %c0_i32_0 = arith.constant 0 : i32
    %c0_i32_1 = arith.constant 0 : i32
    return %c0_i32, %c0_i32_0 : i32, i32
  }
  func.func @transform_2(%arg0: i32) -> (i32, i32) {
    %c0_i32 = arith.constant 0 : i32
    %c0_i32_0 = arith.constant 0 : i32
    %c0_i32_1 = arith.constant 0 : i32
    return %c0_i32, %c0_i32_0 : i32, i32
  }
  func.func @transform_3(%arg0: i32) -> (i32, i32) {
    %c0_i32 = arith.constant 0 : i32
    %c0_i32_0 = arith.constant 0 : i32
    return %arg0, %c0_i32 : i32, i32
  }
}

</mosaic_0001>

<bundles_post_ra>
// kernel: _fused_resident.1
= control target key start
LH: loop header
LB: loop body
LE: loop exit
PB: predicated region body
PF: predicated region fallthrough
CT: control target
= control target key end

     0   :  { %8 = vsyncpa [#allocation3], 0  ;;  %s233_s0 = inlined_call_operand.hbm [shape: f32[8,32], index: 0, kind: input, shape index: {}]   ;;  %s234_s1 = inlined_call_operand.hbm [shape: f32[32,128], index: 1, kind: input, shape index: {}]   ;;  %s235_s2 = inlined_call_operand.vmem [shape: f32[1,128], index: 2, kind: input, shape index: {}]   ;;  %s236_s3 = inlined_call_operand.hbm [shape: f32[8,128], index: 3, kind: output, shape index: {}]  }
   0x1   :  { %9 = vsyncpa [#allocation6], 0 }
   0x2   :  { %10 = vsyncpa [#allocation4], 0  ;;  %s16_s14 = sshll.u32 %s233_s0, 4  ;;  %s196_s15 = smov [#allocation2]   ;;  %s17_s14 = int_to_ptr.hbm [resolvable:$true] %s16_s14 }
   0x3   :  { %s18_s16 = sshll.u32 %s196_s15, 4  ;;  %s26_s19 = sshll.u32 %s234_s1, 4  ;;  %s19_s16 = int_to_ptr.vmem [resolvable:$true] %s18_s16  ;;  %s27_s19 = int_to_ptr.hbm [resolvable:$true] %s26_s19 }
   0x4   :  { %21 = dma.hbm_to_vmem [thread:$0]  %s17_s14, 128, %s19_s16, [#allocation3]  }
   0x5   :  { %s197_s20 = smov [#allocation5]   ;;  %s198_s22 = smov 128  }
   0x6   :  { %s28_s21 = sshll.u32 %s197_s20, 4  ;;  %s199_s23 = smov 8   ;;  %s29_s21 = int_to_ptr.vmem [resolvable:$true] %s28_s21 }
   0x7   :  { %34 = dma.hbm_to_vmem [thread:$0]  %s27_s19, 512, %s29_s21, [#allocation6], %s198_s22, %s198_s22, %s199_s23  }
   0x8   :  { %190 = dma.done.wait [#allocation3], 128  }
   0x9   :  { %191 = vsyncadd [#allocation3], 4294967168 }
   0xa   :  { %192 = dma.done.wait [#allocation6], 512  }
   0xb   :  { %193 = vsyncadd [#allocation6], 4294966784  ;;  %v49_v0 = vld [vmem:[#allocation5 + $0x18] sm:$0xff]  ;;  %v48_v1 = vld [vmem:[#allocation5 + $0x10] sm:$0xff]  ;;  %vm54_vm0 = vcmask 261120   ;;  %s200_s24 = smov [#allocation7]  }
   0xc   :  { %70 = vmatpush.msra.mxu0 %v49_v0  ;;  %v47_v2 = vld [vmem:[#allocation5 + $0x8] sm:$0xff]  ;;  %v46_v3 = vld [vmem:[#allocation5] sm:$0xff]  ;;  %v45_v4 = vld [vmem:[#allocation2] sm:$0xff]  ;;  %s94_s25 = sshll.u32 %s200_s24, 4  ;;  %s96_s28 = sshll.u32 %s236_s3, 4  ;;  %s95_s25 = int_to_ptr.vmem [resolvable:$true] %s94_s25  ;;  %s97_s28 = int_to_ptr.hbm [resolvable:$true] %s96_s28 }
   0xd   :  { %v113_v5 = vld [vmem:[%s235_s2] ss:$0 sm:$0xff] }
   0xe   :  { %71 = vmatpush.msra.mxu0 %v48_v1 }
  0x10   :  { %72 = vmatpush.msra.mxu0 %v47_v2 }
  0x12   :  { %73 = vmatpush.msra.mxu0 %v46_v3 }
  0x13   :  { %107 = vmatmul.msk.f32.vlgmr.msra.gmra.mxu0 %vm54_vm0, %v45_v4 }
  0x90   :  { %v75_v6 = vpop.f32.mrf.mxu0 }
  0x91   :  { %v76_v7 = vadd.f32 %v113_v5, %v75_v6 }
  0x93   :  { %78 = vmax.xlane.f32.xlu0 %v76_v7 }
 0x106   :  { %v79_v8 = vpop.xlane.xlu0 %78 }
 0x107   :  { %v80_v9 = vsub.f32 %v76_v7, %v79_v8 }
 0x109   :  { %v81_v10 = vmul.f32 1.442695, %v80_v9 }
 0x10b   :  { %114 = vpow2.f32 %v81_v10 }
 0x111   :  { %v115_v11 = vpop.eup %114 }
 0x112   :  { %83 = vadd.xlane.f32.xlu0 %v115_v11 }
 0x185   :  { %v84_v12 = vpop.xlane.xlu0 %83 }
 0x186   :  { %116 = vlog2.f32 %v84_v12 }
 0x18c   :  { %v117_v13 = vpop.eup %116 }
 0x18d   :  { %v86_v14 = vmul.f32 0.6931472, %v117_v13 }
 0x18f   :  { %v87_v15 = vsub.f32 %v80_v9, %v86_v14 }
 0x191   :  { %88 = vst [vmem:[#allocation7] sm:$0xff] %v87_v15 }
 0x192   :  { %99 = dma.vmem_to_hbm [thread:$0]  %s95_s25, 128, %s97_s28, [#allocation4]  }
 0x193   :  { %194 = dma.done.wait [#allocation4], 128  }
 0x194   :  { %195 = vsyncadd [#allocation4], 4294967168 }
 0x195   :  { %104 = vsyncpa [#allocation3], 1 }
 0x196   :  { %105 = vsyncpa [#allocation6], 1 }
 0x197   :  { %106 = vsyncpa [#allocation4], 1 }

</bundles_post_ra>
